<compile_context>
chip_gen: v5e
topology: v5e:2x2
jax: 0.10.0
libtpu: 0.0.40
codegen_flags: <defaults>
</compile_context>

<pallas_src>
import functools
import math

import jax
import jax.numpy as jnp
from jax.experimental import pallas as pl
from jax.experimental.pallas import tpu as pltpu


def _mha_kernel(q_ref, k_ref, v_ref, res_ref,
                wq_ref, wk_ref, wv_ref, wo_ref,
                bq_ref, bk_ref, bv_ref, bo_ref,
                o_ref, ctx_ref, *, num_heads):
    """One grid step == one block of Bb batch samples.

    q_ref / res_ref / o_ref: [Bb, Lq, E];  k_ref / v_ref: [Bb, S, E].
    Weights/biases use constant index_maps (resident across grid steps).
    ctx_ref: VMEM scratch [Bb*Lq, E] that assembles all heads' context before
    a single full-K output projection.
    """
    bb, lq, e = q_ref.shape
    s = k_ref.shape[1]
    mq = bb * lq
    mk = bb * s
    hd = e // num_heads

    # ---- In-projections on the flattened [rows, E] slab (3 full-K matmuls).
    # Operands keep their native dtype (bf16 feeds the MXU as bf16); f32 acc.
    q_in = q_ref[...].reshape(mq, e)
    k_in = k_ref[...].reshape(mk, e)
    v_in = v_ref[...].reshape(mk, e)

    # 1/sqrt(head_dim) is pre-folded into wq / bq by the wrapper.
    q = jnp.dot(q_in, wq_ref[...], preferred_element_type=jnp.float32) + bq_ref[...]
    k = jnp.dot(k_in, wk_ref[...], preferred_element_type=jnp.float32) + bk_ref[...]
    v = jnp.dot(v_in, wv_ref[...], preferred_element_type=jnp.float32) + bv_ref[...]

    q3 = q.reshape(bb, lq, e)
    k3 = k.reshape(bb, s, e)
    v3 = v.reshape(bb, s, e)

    # ---- Attention: heads via static lane slices; all Bb samples batched in
    # one dot_general per head (leading batch dim).  Softmax normalization is
    # deferred to a cheap [Lq, hd] rescale after the PV matmul.
    for h in range(num_heads):
        lo = h * hd
        qh = q3[:, :, lo:lo + hd]                          # [Bb, Lq, hd]
        kh = k3[:, :, lo:lo + hd]                          # [Bb, S,  hd]
        vh = v3[:, :, lo:lo + hd]                          # [Bb, S,  hd]

        logits = jnp.einsum('bqd,bkd->bqk', qh, kh,
                            preferred_element_type=jnp.float32)   # [Bb, Lq, S]
        m = jnp.max(logits, axis=-1, keepdims=True)
        p = jnp.exp(logits - m)
        l = jnp.sum(p, axis=-1, keepdims=True)
        ctx = jnp.einsum('bqk,bkd->bqd', p, vh,
                         preferred_element_type=jnp.float32)      # [Bb, Lq, hd]
        ctx = ctx * pl.reciprocal(l, approx=False)
        ctx_ref[:, lo:lo + hd] = ctx.reshape(mq, hd)

    # ---- Single full-K output projection; bias + residual fused.
    res = res_ref[...].reshape(mq, e).astype(jnp.float32)
    out = jnp.dot(ctx_ref[...], wo_ref[...], preferred_element_type=jnp.float32)
    out = out + bo_ref[...] + res
    o_ref[...] = out.reshape(bb, lq, e).astype(o_ref.dtype)


def _pick_block_b(batch, lq, target_rows=256, max_rows=512):
    """Batch samples per grid step.

    Aim for Bb*Lq in the ~256-512 row range to amortize per-step overhead and
    fill the MXU M dim, while preferring >= 2 parallel grid steps (v7x has two
    TensorCores) when each step would still have >= target_rows rows.
    """
    divisors = [d for d in range(1, batch + 1) if batch % d == 0]
    fitting = [d for d in divisors if d * lq <= max_rows]
    bb = max(fitting) if fitting else 1
    if bb == batch and batch > 1:
        smaller = [d for d in divisors if d < batch and d * lq >= target_rows]
        if smaller:
            bb = max(smaller)
    return bb


def multihead_attention(x, params, num_heads, key=None, value=None,
                        residual=None, query_pos=None, key_pos=None,
                        attn_mask=None, key_padding_mask=None):
    """Pallas forward of the MultiheadAttention-with-residual module.

    x / key / value: [L, B, E] seq-first tensors (like nn.MultiheadAttention).
    params: dict with 'wq','wk','wv','wo' of shape [E, E] (right-multiply form,
            i.e. torch_weight.T) and 'bq','bk','bv','bo' of shape [E].
    """
    if attn_mask is not None or key_padding_mask is not None:
        # TODO(synk): attn_mask / key_padding_mask not implemented in kernel.
        raise NotImplementedError("attn_mask / key_padding_mask not supported")

    query = x
    if key is None:
        key = query
    if value is None:
        value = key
    if residual is None:
        residual = x
    if key_pos is None and query_pos is not None and query_pos.shape == key.shape:
        key_pos = query_pos
    if query_pos is not None:
        query = query + query_pos
    if key_pos is not None:
        key = key + key_pos

    Lq, B, E = query.shape
    S = key.shape[0]
    assert E % num_heads == 0, "embed_dims must be divisible by num_heads"
    hd = E // num_heads
    scale = 1.0 / math.sqrt(hd)

    # Fold the query scale into wq / bq (free one-time host-side rescale).
    wq = (params['wq'] * scale).astype(params['wq'].dtype)
    bq = (params['bq'].astype(jnp.float32) * scale).reshape(1, E)
    bk = params['bk'].astype(jnp.float32).reshape(1, E)
    bv = params['bv'].astype(jnp.float32).reshape(1, E)
    bo = params['bo'].astype(jnp.float32).reshape(1, E)

    # [L, B, E] -> [B, L, E]: batch-major blocks, embed dim lane-dense.
    q_b = jnp.transpose(query, (1, 0, 2))
    k_b = jnp.transpose(key, (1, 0, 2))
    v_b = jnp.transpose(value, (1, 0, 2))
    r_b = jnp.transpose(residual, (1, 0, 2))

    Bb = _pick_block_b(B, Lq)
    grid = (B // Bb,)

    q_spec = pl.BlockSpec((Bb, Lq, E), lambda b: (b, 0, 0))
    kv_spec = pl.BlockSpec((Bb, S, E), lambda b: (b, 0, 0))
    w_spec = pl.BlockSpec((E, E), lambda b: (0, 0))      # resident across steps
    b_spec = pl.BlockSpec((1, E), lambda b: (0, 0))

    # Explicit VMEM budget (v7x has only 64 MiB physical VMEM; defaults differ
    # per generation).  Estimate double-buffered blocks + resident weights +
    # scratch, add headroom for compiler temporaries, clamp to a safe range.
    itemsize = jnp.dtype(x.dtype).itemsize
    w_itemsize = jnp.dtype(params['wq'].dtype).itemsize
    est = 2 * ((3 * Bb * Lq + 2 * Bb * S) * E * itemsize
               + 4 * E * E * w_itemsize + 4 * E * 4) + Bb * Lq * E * 4
    vmem_limit = int(min(max(4 * est + (2 << 20), 32 << 20), 48 << 20))

    out = pl.pallas_call(
        functools.partial(_mha_kernel, num_heads=num_heads),
        out_shape=jax.ShapeDtypeStruct((B, Lq, E), x.dtype),
        grid_spec=pltpu.PrefetchScalarGridSpec(
            num_scalar_prefetch=0,
            grid=grid,
            in_specs=[
                q_spec,        # query
                kv_spec,       # key
                kv_spec,       # value
                q_spec,        # residual
                w_spec,        # wq (scale folded)
                w_spec,        # wk
                w_spec,        # wv
                w_spec,        # wo
                b_spec,        # bq (scale folded)
                b_spec,        # bk
                b_spec,        # bv
                b_spec,        # bo
            ],
            out_specs=pl.BlockSpec((Bb, Lq, E), lambda b: (b, 0, 0)),
            scratch_shapes=[pltpu.VMEM((Bb * Lq, E), jnp.float32)],
        ),
        compiler_params=pltpu.CompilerParams(
            dimension_semantics=("parallel",),      # batch steps are independent
            vmem_limit_bytes=vmem_limit),
    )(q_b, k_b, v_b, r_b,
      wq, params['wk'], params['wv'], params['wo'],
      bq, bk, bv, bo)

    # Back to seq-first [L, B, E].
    return jnp.transpose(out, (1, 0, 2))


def _mha_reference(x, params, num_heads, key=None, value=None, residual=None,
                   query_pos=None, key_pos=None):
    """Pure-JAX reference mirroring the PyTorch module forward (eval mode)."""
    query = x
    if key is None:
        key = query
    if value is None:
        value = key
    if residual is None:
        residual = x
    if key_pos is None and query_pos is not None and query_pos.shape == key.shape:
        key_pos = query_pos
    if query_pos is not None:
        query = query + query_pos
    if key_pos is not None:
        key = key + key_pos

    L, B, E = query.shape
    hd = E // num_heads
    hp = jax.lax.Precision.HIGHEST

    q = jnp.einsum('lbe,ef->lbf', query, params['wq'], precision=hp) + params['bq']
    k = jnp.einsum('sbe,ef->sbf', key, params['wk'], precision=hp) + params['bk']
    v = jnp.einsum('sbe,ef->sbf', value, params['wv'], precision=hp) + params['bv']

    qh = q.reshape(L, B, num_heads, hd) * (1.0 / math.sqrt(hd))
    kh = k.reshape(-1, B, num_heads, hd)
    vh = v.reshape(-1, B, num_heads, hd)

    logits = jnp.einsum('qbhd,kbhd->bhqk', qh, kh, precision=hp)
    attn = jax.nn.softmax(logits, axis=-1)
    ctx = jnp.einsum('bhqk,kbhd->qbhd', attn, vh, precision=hp).reshape(L, B, E)
    out = jnp.einsum('lbe,ef->lbf', ctx, params['wo'], precision=hp) + params['bo']
    return residual + out


if __name__ == "__main__":
    root = jax.random.PRNGKey(0)
    kx, kpos, *kw = jax.random.split(root, 11)

    # [num_query, bs, embed_dims] = [8, 2, 32], 4 heads (head_dim = 8).
    L, B, E, H = 8, 2, 32, 4
    x = jax.random.normal(kx, (L, B, E), dtype=jnp.float32)
    query_pos = 0.1 * jax.random.normal(kpos, (L, B, E), dtype=jnp.float32)

    params = {
        'wq': 0.1 * jax.random.normal(kw[0], (E, E), jnp.float32),
        'wk': 0.1 * jax.random.normal(kw[1], (E, E), jnp.float32),
        'wv': 0.1 * jax.random.normal(kw[2], (E, E), jnp.float32),
        'wo': 0.1 * jax.random.normal(kw[3], (E, E), jnp.float32),
        'bq': 0.01 * jax.random.normal(kw[4], (E,), jnp.float32),
        'bk': 0.01 * jax.random.normal(kw[5], (E,), jnp.float32),
        'bv': 0.01 * jax.random.normal(kw[6], (E,), jnp.float32),
        'bo': 0.01 * jax.random.normal(kw[7], (E,), jnp.float32),
    }

    # Self-attention with positional encoding on query (and hence key).
    y = multihead_attention(x, params, num_heads=H, query_pos=query_pos)
    y = jax.block_until_ready(y)
    y_ref = _mha_reference(x, params, H, query_pos=query_pos)
    assert y.shape == x.shape and y.dtype == x.dtype
    assert jnp.allclose(y, y_ref, atol=1e-4, rtol=1e-4), \
        float(jnp.max(jnp.abs(y - y_ref)))

    # Default path: no positional encoding, residual = x.
    y2 = jax.block_until_ready(multihead_attention(x, params, num_heads=H))
    y2_ref = _mha_reference(x, params, H)
    assert jnp.allclose(y2, y2_ref, atol=1e-4, rtol=1e-4), \
        float(jnp.max(jnp.abs(y2 - y2_ref)))

    print("KERNEL_OK")
</pallas_src>

<mosaic_0001>
module attributes {stable_mosaic.version = 11 : i64} {
  func.func @_mha_kernel(%arg0: i32, %arg1: memref<2x8x32xf32, #tpu.memory_space<vmem>>, %arg2: memref<2x8x32xf32, #tpu.memory_space<vmem>>, %arg3: memref<2x8x32xf32, #tpu.memory_space<vmem>>, %arg4: memref<2x8x32xf32, #tpu.memory_space<vmem>>, %arg5: memref<32x32xf32, #tpu.memory_space<vmem>>, %arg6: memref<32x32xf32, #tpu.memory_space<vmem>>, %arg7: memref<32x32xf32, #tpu.memory_space<vmem>>, %arg8: memref<32x32xf32, #tpu.memory_space<vmem>>, %arg9: memref<1x32xf32, #tpu.memory_space<vmem>>, %arg10: memref<1x32xf32, #tpu.memory_space<vmem>>, %arg11: memref<1x32xf32, #tpu.memory_space<vmem>>, %arg12: memref<1x32xf32, #tpu.memory_space<vmem>>, %arg13: memref<2x8x32xf32, #tpu.memory_space<vmem>>, %arg14: memref<16x32xf32, #tpu.memory_space<vmem>>) attributes {dimension_semantics = [#tpu.dimension_semantics<parallel>], iteration_bounds = array<i64: 1>, scalar_prefetch = 0 : i64, scratch_operands = 1 : i64, tpu.core_type = #tpu.core_type<tc>, window_params = [{transform_indices = @transform_0, window_bounds = array<i64: 2, 8, 32>}, {transform_indices = @transform_1, window_bounds = array<i64: 2, 8, 32>}, {transform_indices = @transform_2, window_bounds = array<i64: 2, 8, 32>}, {transform_indices = @transform_3, window_bounds = array<i64: 2, 8, 32>}, {pipeline_mode = #tpu.pipeline_mode<synchronous>, transform_indices = @transform_4, window_bounds = array<i64: 32, 32>}, {pipeline_mode = #tpu.pipeline_mode<synchronous>, transform_indices = @transform_5, window_bounds = array<i64: 32, 32>}, {pipeline_mode = #tpu.pipeline_mode<synchronous>, transform_indices = @transform_6, window_bounds = array<i64: 32, 32>}, {pipeline_mode = #tpu.pipeline_mode<synchronous>, transform_indices = @transform_7, window_bounds = array<i64: 32, 32>}, {pipeline_mode = #tpu.pipeline_mode<synchronous>, transform_indices = @transform_8, window_bounds = array<i64: 1, 32>}, {pipeline_mode = #tpu.pipeline_mode<synchronous>, transform_indices = @transform_9, window_bounds = array<i64: 1, 32>}, {pipeline_mode = #tpu.pipeline_mode<synchronous>, transform_indices = @transform_10, window_bounds = array<i64: 1, 32>}, {pipeline_mode = #tpu.pipeline_mode<synchronous>, transform_indices = @transform_11, window_bounds = array<i64: 1, 32>}, {transform_indices = @transform_12, window_bounds = array<i64: 2, 8, 32>}]} {
    %c0 = arith.constant 0 : index
    %c0_0 = arith.constant 0 : index
    %c0_1 = arith.constant 0 : index
    %0 = vector.load %arg1[%c0, %c0_0, %c0_1] : memref<2x8x32xf32, #tpu.memory_space<vmem>>, vector<2x8x32xf32>
    %1 = vector.shape_cast %0 : vector<2x8x32xf32> to vector<16x32xf32>
    %c0_2 = arith.constant 0 : index
    %c0_3 = arith.constant 0 : index
    %c0_4 = arith.constant 0 : index
    %2 = vector.load %arg2[%c0_2, %c0_3, %c0_4] : memref<2x8x32xf32, #tpu.memory_space<vmem>>, vector<2x8x32xf32>
    %3 = vector.shape_cast %2 : vector<2x8x32xf32> to vector<16x32xf32>
    %c0_5 = arith.constant 0 : index
    %c0_6 = arith.constant 0 : index
    %c0_7 = arith.constant 0 : index
    %4 = vector.load %arg3[%c0_5, %c0_6, %c0_7] : memref<2x8x32xf32, #tpu.memory_space<vmem>>, vector<2x8x32xf32>
    %5 = vector.shape_cast %4 : vector<2x8x32xf32> to vector<16x32xf32>
    %c0_8 = arith.constant 0 : index
    %c0_9 = arith.constant 0 : index
    %6 = vector.load %arg5[%c0_8, %c0_9] : memref<32x32xf32, #tpu.memory_space<vmem>>, vector<32x32xf32>
    %cst = arith.constant dense<0.000000e+00> : vector<16x32xf32>
    %7 = tpu.matmul %1, %6, %cst {dimension_numbers = #tpu.dot_dimension_numbers<[1], [0], [0], [1], [0, 0, 1, 1], [], []>} : vector<16x32xf32>, vector<32x32xf32>, vector<16x32xf32> -> vector<16x32xf32>
    %c0_10 = arith.constant 0 : index
    %c0_11 = arith.constant 0 : index
    %8 = vector.load %arg9[%c0_10, %c0_11] : memref<1x32xf32, #tpu.memory_space<vmem>>, vector<1x32xf32>
    %9 = vector.broadcast %8 : vector<1x32xf32> to vector<16x32xf32>
    %10 = arith.addf %7, %9 : vector<16x32xf32>
    %c0_12 = arith.constant 0 : index
    %c0_13 = arith.constant 0 : index
    %11 = vector.load %arg6[%c0_12, %c0_13] : memref<32x32xf32, #tpu.memory_space<vmem>>, vector<32x32xf32>
    %cst_14 = arith.constant dense<0.000000e+00> : vector<16x32xf32>
    %12 = tpu.matmul %3, %11, %cst_14 {dimension_numbers = #tpu.dot_dimension_numbers<[1], [0], [0], [1], [0, 0, 1, 1], [], []>} : vector<16x32xf32>, vector<32x32xf32>, vector<16x32xf32> -> vector<16x32xf32>
    %c0_15 = arith.constant 0 : index
    %c0_16 = arith.constant 0 : index
    %13 = vector.load %arg10[%c0_15, %c0_16] : memref<1x32xf32, #tpu.memory_space<vmem>>, vector<1x32xf32>
    %14 = vector.broadcast %13 : vector<1x32xf32> to vector<16x32xf32>
    %15 = arith.addf %12, %14 : vector<16x32xf32>
    %c0_17 = arith.constant 0 : index
    %c0_18 = arith.constant 0 : index
    %16 = vector.load %arg7[%c0_17, %c0_18] : memref<32x32xf32, #tpu.memory_space<vmem>>, vector<32x32xf32>
    %cst_19 = arith.constant dense<0.000000e+00> : vector<16x32xf32>
    %17 = tpu.matmul %5, %16, %cst_19 {dimension_numbers = #tpu.dot_dimension_numbers<[1], [0], [0], [1], [0, 0, 1, 1], [], []>} : vector<16x32xf32>, vector<32x32xf32>, vector<16x32xf32> -> vector<16x32xf32>
    %c0_20 = arith.constant 0 : index
    %c0_21 = arith.constant 0 : index
    %18 = vector.load %arg11[%c0_20, %c0_21] : memref<1x32xf32, #tpu.memory_space<vmem>>, vector<1x32xf32>
    %19 = vector.broadcast %18 : vector<1x32xf32> to vector<16x32xf32>
    %20 = arith.addf %17, %19 : vector<16x32xf32>
    %21 = vector.shape_cast %10 : vector<16x32xf32> to vector<2x8x32xf32>
    %22 = vector.shape_cast %15 : vector<16x32xf32> to vector<2x8x32xf32>
    %23 = vector.shape_cast %20 : vector<16x32xf32> to vector<2x8x32xf32>
    %24 = vector.extract_strided_slice %21 {offsets = [0, 0, 0], sizes = [2, 8, 8], strides = [1, 1, 1]} : vector<2x8x32xf32> to vector<2x8x8xf32>
    %25 = vector.extract_strided_slice %22 {offsets = [0, 0, 0], sizes = [2, 8, 8], strides = [1, 1, 1]} : vector<2x8x32xf32> to vector<2x8x8xf32>
    %26 = vector.extract_strided_slice %23 {offsets = [0, 0, 0], sizes = [2, 8, 8], strides = [1, 1, 1]} : vector<2x8x32xf32> to vector<2x8x8xf32>
    "tpu.trace_start"() <{level = 10 : i32, message = "bqd,bkd->bqk"}> : () -> ()
    %cst_22 = arith.constant dense<0.000000e+00> : vector<2x8x8xf32>
    %27 = tpu.matmul %24, %25, %cst_22 {dimension_numbers = #tpu.dot_dimension_numbers<[2], [2], [1], [1], [0, 0, 0, 1, 1, 1], [0], [0]>} : vector<2x8x8xf32>, vector<2x8x8xf32>, vector<2x8x8xf32> -> vector<2x8x8xf32>
    "tpu.trace_stop"() : () -> ()
    %cst_23 = arith.constant dense<0xFF800000> : vector<2x8xf32>
    %28 = vector.multi_reduction <maximumf>, %27, %cst_23 [2] : vector<2x8x8xf32> to vector<2x8xf32>
    %29 = vector.shape_cast %28 : vector<2x8xf32> to vector<2x8x1xf32>
    %30 = vector.broadcast %29 : vector<2x8x1xf32> to vector<2x8x8xf32>
    %31 = arith.subf %27, %30 : vector<2x8x8xf32>
    %32 = math.exp %31 : vector<2x8x8xf32>
    %cst_24 = arith.constant dense<0.000000e+00> : vector<2x8xf32>
    %33 = vector.multi_reduction <add>, %32, %cst_24 [2] : vector<2x8x8xf32> to vector<2x8xf32>
    %34 = vector.shape_cast %33 : vector<2x8xf32> to vector<2x8x1xf32>
    "tpu.trace_start"() <{level = 10 : i32, message = "bqk,bkd->bqd"}> : () -> ()
    %cst_25 = arith.constant dense<0.000000e+00> : vector<2x8x8xf32>
    %35 = tpu.matmul %32, %26, %cst_25 {dimension_numbers = #tpu.dot_dimension_numbers<[2], [1], [1], [2], [0, 0, 0, 1, 1, 2], [0], [0]>} : vector<2x8x8xf32>, vector<2x8x8xf32>, vector<2x8x8xf32> -> vector<2x8x8xf32>
    "tpu.trace_stop"() : () -> ()
    %36 = tpu.reciprocal %34 : vector<2x8x1xf32> -> vector<2x8x1xf32>
    %37 = vector.broadcast %36 : vector<2x8x1xf32> to vector<2x8x8xf32>
    %38 = arith.mulf %35, %37 : vector<2x8x8xf32>
    %39 = vector.shape_cast %38 : vector<2x8x8xf32> to vector<16x8xf32>
    %c0_26 = arith.constant 0 : index
    %c0_27 = arith.constant 0 : index
    %40 = vector.load %arg14[%c0_26, %c0_27] : memref<16x32xf32, #tpu.memory_space<vmem>>, vector<16x8xf32>
    tpu.vector_store %arg14[%c0_26, %c0_27], %39 {strides = array<i32>} : memref<16x32xf32, #tpu.memory_space<vmem>>, vector<16x8xf32>,
    %41 = vector.extract_strided_slice %21 {offsets = [0, 0, 8], sizes = [2, 8, 8], strides = [1, 1, 1]} : vector<2x8x32xf32> to vector<2x8x8xf32>
    %42 = vector.extract_strided_slice %22 {offsets = [0, 0, 8], sizes = [2, 8, 8], strides = [1, 1, 1]} : vector<2x8x32xf32> to vector<2x8x8xf32>
    %43 = vector.extract_strided_slice %23 {offsets = [0, 0, 8], sizes = [2, 8, 8], strides = [1, 1, 1]} : vector<2x8x32xf32> to vector<2x8x8xf32>
    "tpu.trace_start"() <{level = 10 : i32, message = "bqd,bkd->bqk"}> : () -> ()
    %cst_28 = arith.constant dense<0.000000e+00> : vector<2x8x8xf32>
    %44 = tpu.matmul %41, %42, %cst_28 {dimension_numbers = #tpu.dot_dimension_numbers<[2], [2], [1], [1], [0, 0, 0, 1, 1, 1], [0], [0]>} : vector<2x8x8xf32>, vector<2x8x8xf32>, vector<2x8x8xf32> -> vector<2x8x8xf32>
    "tpu.trace_stop"() : () -> ()
    %cst_29 = arith.constant dense<0xFF800000> : vector<2x8xf32>
    %45 = vector.multi_reduction <maximumf>, %44, %cst_29 [2] : vector<2x8x8xf32> to vector<2x8xf32>
    %46 = vector.shape_cast %45 : vector<2x8xf32> to vector<2x8x1xf32>
    %47 = vector.broadcast %46 : vector<2x8x1xf32> to vector<2x8x8xf32>
    %48 = arith.subf %44, %47 : vector<2x8x8xf32>
    %49 = math.exp %48 : vector<2x8x8xf32>
    %cst_30 = arith.constant dense<0.000000e+00> : vector<2x8xf32>
    %50 = vector.multi_reduction <add>, %49, %cst_30 [2] : vector<2x8x8xf32> to vector<2x8xf32>
    %51 = vector.shape_cast %50 : vector<2x8xf32> to vector<2x8x1xf32>
    "tpu.trace_start"() <{level = 10 : i32, message = "bqk,bkd->bqd"}> : () -> ()
    %cst_31 = arith.constant dense<0.000000e+00> : vector<2x8x8xf32>
    %52 = tpu.matmul %49, %43, %cst_31 {dimension_numbers = #tpu.dot_dimension_numbers<[2], [1], [1], [2], [0, 0, 0, 1, 1, 2], [0], [0]>} : vector<2x8x8xf32>, vector<2x8x8xf32>, vector<2x8x8xf32> -> vector<2x8x8xf32>
    "tpu.trace_stop"() : () -> ()
    %53 = tpu.reciprocal %51 : vector<2x8x1xf32> -> vector<2x8x1xf32>
    %54 = vector.broadcast %53 : vector<2x8x1xf32> to vector<2x8x8xf32>
    %55 = arith.mulf %52, %54 : vector<2x8x8xf32>
    %56 = vector.shape_cast %55 : vector<2x8x8xf32> to vector<16x8xf32>
    %c0_32 = arith.constant 0 : index
    %c8 = arith.constant 8 : index
    %57 = vector.load %arg14[%c0_32, %c8] : memref<16x32xf32, #tpu.memory_space<vmem>>, vector<16x8xf32>
    tpu.vector_store %arg14[%c0_32, %c8], %56 {strides = array<i32>} : memref<16x32xf32, #tpu.memory_space<vmem>>, vector<16x8xf32>,
    %58 = vector.extract_strided_slice %21 {offsets = [0, 0, 16], sizes = [2, 8, 8], strides = [1, 1, 1]} : vector<2x8x32xf32> to vector<2x8x8xf32>
    %59 = vector.extract_strided_slice %22 {offsets = [0, 0, 16], sizes = [2, 8, 8], strides = [1, 1, 1]} : vector<2x8x32xf32> to vector<2x8x8xf32>
    %60 = vector.extract_strided_slice %23 {offsets = [0, 0, 16], sizes = [2, 8, 8], strides = [1, 1, 1]} : vector<2x8x32xf32> to vector<2x8x8xf32>
    "tpu.trace_start"() <{level = 10 : i32, message = "bqd,bkd->bqk"}> : () -> ()
    %cst_33 = arith.constant dense<0.000000e+00> : vector<2x8x8xf32>
    %61 = tpu.matmul %58, %59, %cst_33 {dimension_numbers = #tpu.dot_dimension_numbers<[2], [2], [1], [1], [0, 0, 0, 1, 1, 1], [0], [0]>} : vector<2x8x8xf32>, vector<2x8x8xf32>, vector<2x8x8xf32> -> vector<2x8x8xf32>
    "tpu.trace_stop"() : () -> ()
    %cst_34 = arith.constant dense<0xFF800000> : vector<2x8xf32>
    %62 = vector.multi_reduction <maximumf>, %61, %cst_34 [2] : vector<2x8x8xf32> to vector<2x8xf32>
    %63 = vector.shape_cast %62 : vector<2x8xf32> to vector<2x8x1xf32>
    %64 = vector.broadcast %63 : vector<2x8x1xf32> to vector<2x8x8xf32>
    %65 = arith.subf %61, %64 : vector<2x8x8xf32>
    %66 = math.exp %65 : vector<2x8x8xf32>
    %cst_35 = arith.constant dense<0.000000e+00> : vector<2x8xf32>
    %67 = vector.multi_reduction <add>, %66, %cst_35 [2] : vector<2x8x8xf32> to vector<2x8xf32>
    %68 = vector.shape_cast %67 : vector<2x8xf32> to vector<2x8x1xf32>
    "tpu.trace_start"() <{level = 10 : i32, message = "bqk,bkd->bqd"}> : () -> ()
    %cst_36 = arith.constant dense<0.000000e+00> : vector<2x8x8xf32>
    %69 = tpu.matmul %66, %60, %cst_36 {dimension_numbers = #tpu.dot_dimension_numbers<[2], [1], [1], [2], [0, 0, 0, 1, 1, 2], [0], [0]>} : vector<2x8x8xf32>, vector<2x8x8xf32>, vector<2x8x8xf32> -> vector<2x8x8xf32>
    "tpu.trace_stop"() : () -> ()
    %70 = tpu.reciprocal %68 : vector<2x8x1xf32> -> vector<2x8x1xf32>
    %71 = vector.broadcast %70 : vector<2x8x1xf32> to vector<2x8x8xf32>
    %72 = arith.mulf %69, %71 : vector<2x8x8xf32>
    %73 = vector.shape_cast %72 : vector<2x8x8xf32> to vector<16x8xf32>
    %c0_37 = arith.constant 0 : index
    %c16 = arith.constant 16 : index
    %74 = vector.load %arg14[%c0_37, %c16] : memref<16x32xf32, #tpu.memory_space<vmem>>, vector<16x8xf32>
    tpu.vector_store %arg14[%c0_37, %c16], %73 {strides = array<i32>} : memref<16x32xf32, #tpu.memory_space<vmem>>, vector<16x8xf32>,
    %75 = vector.extract_strided_slice %21 {offsets = [0, 0, 24], sizes = [2, 8, 8], strides = [1, 1, 1]} : vector<2x8x32xf32> to vector<2x8x8xf32>
    %76 = vector.extract_strided_slice %22 {offsets = [0, 0, 24], sizes = [2, 8, 8], strides = [1, 1, 1]} : vector<2x8x32xf32> to vector<2x8x8xf32>
    %77 = vector.extract_strided_slice %23 {offsets = [0, 0, 24], sizes = [2, 8, 8], strides = [1, 1, 1]} : vector<2x8x32xf32> to vector<2x8x8xf32>
    "tpu.trace_start"() <{level = 10 : i32, message = "bqd,bkd->bqk"}> : () -> ()
    %cst_38 = arith.constant dense<0.000000e+00> : vector<2x8x8xf32>
    %78 = tpu.matmul %75, %76, %cst_38 {dimension_numbers = #tpu.dot_dimension_numbers<[2], [2], [1], [1], [0, 0, 0, 1, 1, 1], [0], [0]>} : vector<2x8x8xf32>, vector<2x8x8xf32>, vector<2x8x8xf32> -> vector<2x8x8xf32>
    "tpu.trace_stop"() : () -> ()
    %cst_39 = arith.constant dense<0xFF800000> : vector<2x8xf32>
    %79 = vector.multi_reduction <maximumf>, %78, %cst_39 [2] : vector<2x8x8xf32> to vector<2x8xf32>
    %80 = vector.shape_cast %79 : vector<2x8xf32> to vector<2x8x1xf32>
    %81 = vector.broadcast %80 : vector<2x8x1xf32> to vector<2x8x8xf32>
    %82 = arith.subf %78, %81 : vector<2x8x8xf32>
    %83 = math.exp %82 : vector<2x8x8xf32>
    %cst_40 = arith.constant dense<0.000000e+00> : vector<2x8xf32>
    %84 = vector.multi_reduction <add>, %83, %cst_40 [2] : vector<2x8x8xf32> to vector<2x8xf32>
    %85 = vector.shape_cast %84 : vector<2x8xf32> to vector<2x8x1xf32>
    "tpu.trace_start"() <{level = 10 : i32, message = "bqk,bkd->bqd"}> : () -> ()
    %cst_41 = arith.constant dense<0.000000e+00> : vector<2x8x8xf32>
    %86 = tpu.matmul %83, %77, %cst_41 {dimension_numbers = #tpu.dot_dimension_numbers<[2], [1], [1], [2], [0, 0, 0, 1, 1, 2], [0], [0]>} : vector<2x8x8xf32>, vector<2x8x8xf32>, vector<2x8x8xf32> -> vector<2x8x8xf32>
    "tpu.trace_stop"() : () -> ()
    %87 = tpu.reciprocal %85 : vector<2x8x1xf32> -> vector<2x8x1xf32>
    %88 = vector.broadcast %87 : vector<2x8x1xf32> to vector<2x8x8xf32>
    %89 = arith.mulf %86, %88 : vector<2x8x8xf32>
    %90 = vector.shape_cast %89 : vector<2x8x8xf32> to vector<16x8xf32>
    %c0_42 = arith.constant 0 : index
    %c24 = arith.constant 24 : index
    %91 = vector.load %arg14[%c0_42, %c24] : memref<16x32xf32, #tpu.memory_space<vmem>>, vector<16x8xf32>
    tpu.vector_store %arg14[%c0_42, %c24], %90 {strides = array<i32>} : memref<16x32xf32, #tpu.memory_space<vmem>>, vector<16x8xf32>,
    %c0_43 = arith.constant 0 : index
    %c0_44 = arith.constant 0 : index
    %c0_45 = arith.constant 0 : index
    %92 = vector.load %arg4[%c0_43, %c0_44, %c0_45] : memref<2x8x32xf32, #tpu.memory_space<vmem>>, vector<2x8x32xf32>
    %93 = vector.shape_cast %92 : vector<2x8x32xf32> to vector<16x32xf32>
    %c0_46 = arith.constant 0 : index
    %c0_47 = arith.constant 0 : index
    %94 = vector.load %arg14[%c0_46, %c0_47] : memref<16x32xf32, #tpu.memory_space<vmem>>, vector<16x32xf32>
    %c0_48 = arith.constant 0 : index
    %c0_49 = arith.constant 0 : index
    %95 = vector.load %arg8[%c0_48, %c0_49] : memref<32x32xf32, #tpu.memory_space<vmem>>, vector<32x32xf32>
    %cst_50 = arith.constant dense<0.000000e+00> : vector<16x32xf32>
    %96 = tpu.matmul %94, %95, %cst_50 {dimension_numbers = #tpu.dot_dimension_numbers<[1], [0], [0], [1], [0, 0, 1, 1], [], []>} : vector<16x32xf32>, vector<32x32xf32>, vector<16x32xf32> -> vector<16x32xf32>
    %c0_51 = arith.constant 0 : index
    %c0_52 = arith.constant 0 : index
    %97 = vector.load %arg12[%c0_51, %c0_52] : memref<1x32xf32, #tpu.memory_space<vmem>>, vector<1x32xf32>
    %98 = vector.broadcast %97 : vector<1x32xf32> to vector<16x32xf32>
    %99 = arith.addf %96, %98 : vector<16x32xf32>
    %100 = arith.addf %99, %93 : vector<16x32xf32>
    %101 = vector.shape_cast %100 : vector<16x32xf32> to vector<2x8x32xf32>
    %c0_53 = arith.constant 0 : index
    %c0_54 = arith.constant 0 : index
    %c0_55 = arith.constant 0 : index
    %102 = vector.load %arg13[%c0_53, %c0_54, %c0_55] : memref<2x8x32xf32, #tpu.memory_space<vmem>>, vector<2x8x32xf32>
    tpu.vector_store %arg13[%c0_53, %c0_54, %c0_55], %101 {strides = array<i32>} : memref<2x8x32xf32, #tpu.memory_space<vmem>>, vector<2x8x32xf32>,
    return
  }
  func.func @transform_0(%arg0: i32) -> (i32, i32, i32) {
    %c0_i32 = arith.constant 0 : i32
    %c0_i32_0 = arith.constant 0 : i32
    %c0_i32_1 = arith.constant 0 : i32
    return %arg0, %c0_i32, %c0_i32_0 : i32, i32, i32
  }
  func.func @transform_1(%arg0: i32) -> (i32, i32, i32) {
    %c0_i32 = arith.constant 0 : i32
    %c0_i32_0 = arith.constant 0 : i32
    %c0_i32_1 = arith.constant 0 : i32
    return %arg0, %c0_i32, %c0_i32_0 : i32, i32, i32
  }
  func.func @transform_2(%arg0: i32) -> (i32, i32, i32) {
    %c0_i32 = arith.constant 0 : i32
    %c0_i32_0 = arith.constant 0 : i32
    %c0_i32_1 = arith.constant 0 : i32
    return %arg0, %c0_i32, %c0_i32_0 : i32, i32, i32
  }
  func.func @transform_3(%arg0: i32) -> (i32, i32, i32) {
    %c0_i32 = arith.constant 0 : i32
    %c0_i32_0 = arith.constant 0 : i32
    %c0_i32_1 = arith.constant 0 : i32
    return %arg0, %c0_i32, %c0_i32_0 : i32, i32, i32
  }
  func.func @transform_4(%arg0: i32) -> (i32, i32) {
    %c0_i32 = arith.constant 0 : i32
    %c0_i32_0 = arith.constant 0 : i32
    %c0_i32_1 = arith.constant 0 : i32
    return %c0_i32, %c0_i32_0 : i32, i32
  }
  func.func @transform_5(%arg0: i32) -> (i32, i32) {
    %c0_i32 = arith.constant 0 : i32
    %c0_i32_0 = arith.constant 0 : i32
    %c0_i32_1 = arith.constant 0 : i32
    return %c0_i32, %c0_i32_0 : i32, i32
  }
  func.func @transform_6(%arg0: i32) -> (i32, i32) {
    %c0_i32 = arith.constant 0 : i32
    %c0_i32_0 = arith.constant 0 : i32
    %c0_i32_1 = arith.constant 0 : i32
    return %c0_i32, %c0_i32_0 : i32, i32
  }
  func.func @transform_7(%arg0: i32) -> (i32, i32) {
    %c0_i32 = arith.constant 0 : i32
    %c0_i32_0 = arith.constant 0 : i32
    %c0_i32_1 = arith.constant 0 : i32
    return %c0_i32, %c0_i32_0 : i32, i32
  }
  func.func @transform_8(%arg0: i32) -> (i32, i32) {
    %c0_i32 = arith.constant 0 : i32
    %c0_i32_0 = arith.constant 0 : i32
    %c0_i32_1 = arith.constant 0 : i32
    return %c0_i32, %c0_i32_0 : i32, i32
  }
  func.func @transform_9(%arg0: i32) -> (i32, i32) {
    %c0_i32 = arith.constant 0 : i32
    %c0_i32_0 = arith.constant 0 : i32
    %c0_i32_1 = arith.constant 0 : i32
    return %c0_i32, %c0_i32_0 : i32, i32
  }
  func.func @transform_10(%arg0: i32) -> (i32, i32) {
    %c0_i32 = arith.constant 0 : i32
    %c0_i32_0 = arith.constant 0 : i32
    %c0_i32_1 = arith.constant 0 : i32
    return %c0_i32, %c0_i32_0 : i32, i32
  }
  func.func @transform_11(%arg0: i32) -> (i32, i32) {
    %c0_i32 = arith.constant 0 : i32
    %c0_i32_0 = arith.constant 0 : i32
    %c0_i32_1 = arith.constant 0 : i32
    return %c0_i32, %c0_i32_0 : i32, i32
  }
  func.func @transform_12(%arg0: i32) -> (i32, i32, i32) {
    %c0_i32 = arith.constant 0 : i32
    %c0_i32_0 = arith.constant 0 : i32
    %c0_i32_1 = arith.constant 0 : i32
    return %arg0, %c0_i32, %c0_i32_0 : i32, i32, i32
  }
}

</mosaic_0001>

<bundles_post_ra>
// kernel: tpu_custom_call.1
= control target key start
LH: loop header
LB: loop body
LE: loop exit
PB: predicated region body
PF: predicated region fallthrough
CT: control target
= control target key end

     0   :  { %17 = vsyncpa [#allocation4], 0  ;;  %s1634_s0 = inlined_call_operand.hbm [shape: f32[2,8,32], index: 0, kind: input, shape index: {}]   ;;  %s1635_s1 = inlined_call_operand.hbm [shape: f32[2,8,32], index: 1, kind: input, shape index: {}]   ;;  %s1636_s2 = inlined_call_operand.hbm [shape: f32[2,8,32], index: 2, kind: input, shape index: {}]   ;;  %s1637_s3 = inlined_call_operand.hbm [shape: f32[2,8,32], index: 3, kind: input, shape index: {}]   ;;  %s1638_s4 = inlined_call_operand.hbm [shape: f32[32,32], index: 4, kind: input, shape index: {}]   ;;  %s1639_s5 = inlined_call_operand.hbm [shape: f32[32,32], index: 5, kind: input, shape index: {}]   ;;  %s1640_s6 = inlined_call_operand.hbm [shape: f32[32,32], index: 6, kind: input, shape index: {}]   ;;  %s1641_s7 = inlined_call_operand.hbm [shape: f32[32,32], index: 7, kind: input, shape index: {}]   ;;  %s1642_s8 = inlined_call_operand.vmem [shape: f32[1,32], index: 8, kind: input, shape index: {}]   ;;  %s1643_s9 = inlined_call_operand.vmem [shape: f32[1,32], index: 9, kind: input, shape index: {}]   ;;  %s1644_s10 = inlined_call_operand.vmem [shape: f32[1,32], index: 10, kind: input, shape index: {}]   ;;  %s1645_s11 = inlined_call_operand.vmem [shape: f32[1,32], index: 11, kind: input, shape index: {}]   ;;  %s1646_s12 = inlined_call_operand.hbm [shape: f32[2,8,32], index: 12, kind: output, shape index: {}]  }
   0x1   :  { %18 = vsyncpa [#allocation7], 0 }
   0x2   :  { %19 = vsyncpa [#allocation10], 0 }
   0x3   :  { %20 = vsyncpa [#allocation13], 0 }
   0x4   :  { %21 = vsyncpa [#allocation16], 0 }
   0x5   :  { %22 = vsyncpa [#allocation5], 0  ;;  %s40_s23 = sshll.u32 %s1635_s1, 4  ;;  %s1326_s24 = smov [#allocation6]   ;;  %s41_s23 = int_to_ptr.hbm [resolvable:$true] %s40_s23 }
   0x6   :  { %s42_s25 = sshll.u32 %s1326_s24, 4  ;;  %s66_s28 = sshll.u32 %s1637_s3, 4  ;;  %s43_s25 = int_to_ptr.vmem [resolvable:$true] %s42_s25  ;;  %s67_s28 = int_to_ptr.hbm [resolvable:$true] %s66_s28 }
   0x7   :  { %s1327_s29 = smov 128   ;;  %s1328_s30 = smov 8  }
   0x8   :  { %48 = dma.hbm_to_vmem [thread:$0]  %s41_s23, 256, %s43_s25, [#allocation7], %s1327_s29, %s1327_s29, %s1328_s30  }
   0x9   :  { %s1329_s13 = smov [#allocation9]   ;;  %s92_s1 = sshll.u32 %s1639_s5, 4  ;;  %s93_s1 = int_to_ptr.hbm [resolvable:$true] %s92_s1 }
   0xa   :  { %s68_s14 = sshll.u32 %s1329_s13, 4  ;;  %s27_s18 = sshll.u32 %s1634_s0, 4  ;;  %s69_s14 = int_to_ptr.vmem [resolvable:$true] %s68_s14  ;;  %s28_s18 = int_to_ptr.hbm [resolvable:$true] %s27_s18 }
   0xb   :  { %74 = dma.hbm_to_vmem [thread:$0]  %s67_s28, 256, %s69_s14, [#allocation10], %s1327_s29, %s1327_s29, %s1328_s30  }
   0xc   :  { %s1330_s19 = smov [#allocation12]   ;;  %s1331_s21 = smov [#allocation3]  }
   0xd   :  { %s94_s20 = sshll.u32 %s1330_s19, 4  ;;  %s29_s5 = sshll.u32 %s1331_s21, 4  ;;  %s95_s20 = int_to_ptr.vmem [resolvable:$true] %s94_s20  ;;  %s30_s5 = int_to_ptr.vmem [resolvable:$true] %s29_s5 }
   0xe   :  { %100 = dma.hbm_to_vmem [thread:$0]  %s93_s1, 512, %s95_s20, [#allocation13], %s1327_s29, %s1327_s29, %s1328_s30  }
   0xf   :  { %s53_s24 = sshll.u32 %s1636_s2, 4  ;;  %s79_s26 = sshll.u32 %s1638_s4, 4  ;;  %s54_s24 = int_to_ptr.hbm [resolvable:$true] %s53_s24  ;;  %s80_s26 = int_to_ptr.hbm [resolvable:$true] %s79_s26 }
  0x10   :  { %35 = dma.hbm_to_vmem [thread:$0]  %s28_s18, 256, %s30_s5, [#allocation4], %s1327_s29, %s1327_s29, %s1328_s30  }
  0x11   :  { %s1332_s27 = smov [#allocation8]   ;;  %s1333_s13 = smov [#allocation11]  }
  0x12   :  { %s55_s28 = sshll.u32 %s1332_s27, 4  ;;  %s81_s2 = sshll.u32 %s1333_s13, 4  ;;  %s56_s28 = int_to_ptr.vmem [resolvable:$true] %s55_s28  ;;  %s82_s2 = int_to_ptr.vmem [resolvable:$true] %s81_s2 }
  0x13   :  { %61 = dma.hbm_to_vmem [thread:$0]  %s54_s24, 256, %s56_s28, [#allocation7], %s1327_s29, %s1327_s29, %s1328_s30  }
  0x14   :  { %s105_s16 = sshll.u32 %s1640_s6, 4  ;;  %s118_s3 = sshll.u32 %s1641_s7, 4  ;;  %s106_s16 = int_to_ptr.hbm [resolvable:$true] %s105_s16  ;;  %s119_s3 = int_to_ptr.hbm [resolvable:$true] %s118_s3 }
  0x15   :  { %87 = dma.hbm_to_vmem [thread:$0]  %s80_s26, 512, %s82_s2, [#allocation10], %s1327_s29, %s1327_s29, %s1328_s30  }
  0x16   :  { %s1334_s17 = smov [#allocation14]   ;;  %s1335_s19 = smov [#allocation15]  }
  0x17   :  { %s107_s18 = sshll.u32 %s1334_s17, 4  ;;  %s120_s6 = sshll.u32 %s1335_s19, 4  ;;  %s108_s18 = int_to_ptr.vmem [resolvable:$true] %s107_s18  ;;  %s121_s6 = int_to_ptr.vmem [resolvable:$true] %s120_s6 }
  0x18   :  { %113 = dma.hbm_to_vmem [thread:$0]  %s106_s16, 512, %s108_s18, [#allocation13], %s1327_s29, %s1327_s29, %s1328_s30  }
  0x19   :  { %126 = dma.hbm_to_vmem [thread:$0]  %s119_s3, 512, %s121_s6, [#allocation16], %s1327_s29, %s1327_s29, %s1328_s30  }
  0x1a   :  { %1314 = dma.done.wait [#allocation4], 256  }
  0x1b   :  { %1315 = vsyncadd [#allocation4], 4294967040 }
  0x1c   :  { %1316 = dma.done.wait [#allocation7], 512  }
  0x1d   :  { %1317 = vsyncadd [#allocation7], 4294966784 }
  0x1e   :  { %1318 = dma.done.wait [#allocation10], 768  }
  0x1f   :  { %1319 = vsyncadd [#allocation10], 4294966528 }
  0x20   :  { %1320 = dma.done.wait [#allocation13], 1024  }
  0x21   :  { %1321 = vsyncadd [#allocation13], 4294966272 }
  0x22   :  { %1322 = dma.done.wait [#allocation16], 512  }
  0x23   :  { %1323 = vsyncadd [#allocation16], 4294966784  ;;  %v214_v0 = vld [vmem:[#allocation12 + $0x18] sm:$0xff]  ;;  %v213_v1 = vld [vmem:[#allocation12 + $0x10] sm:$0xff]  ;;  %vm181_vm0 = vcmask 261120   ;;  %vm285_vm1 = vcmask 64512  }
  0x24   :  { %v176_v2 = vld [vmem:[#allocation11 + $0x18] sm:$0xff]  ;;  %237 = vmatpush.msra.mxu1 %v214_v0  ;;  %1037 = vmatpush.msra.mxu2 %v214_v0  ;;  %v175_v3 = vld [vmem:[#allocation11 + $0x10] sm:$0xff]  ;;  %v212_v4 = vld [vmem:[#allocation12 + $0x8] sm:$0xff]  ;;  %s1336_s22 = smov 112   ;;  %s1337_s23 = smov 120  }
  0x25   :  { %200 = vmatpush.msra.mxu0 %v176_v2  ;;  %v174_v5 = vld [vmem:[#allocation11 + $0x8] sm:$0xff]  ;;  %v211_v6 = vld [vmem:[#allocation12] sm:$0xff]  ;;  %v169_v7 = vld [vmem:[#allocation6] sm:$0xff]  ;;  %s1338_s24 = smov 104   ;;  %s1340_s0 = smov 24  }
  0x26   :  { %238 = vmatpush.msra.mxu1 %v213_v1  ;;  %1038 = vmatpush.msra.mxu2 %v213_v1  ;;  %v173_v8 = vld [vmem:[#allocation11] sm:$0xff]  ;;  %v170_v9 = vld [vmem:[#allocation6 + $0x8] sm:$0xff]  ;;  %v250_v12 = vld [vmem:[#allocation14 + $0x10] sm:$0xff]  ;;  %s1341_s27 = smov [#allocation17]   ;;  %s988_s14 = sshll.u32 %s1646_s12, 4  ;;  %s989_s14 = int_to_ptr.hbm [resolvable:$true] %s988_s14 }
  0x27   :  { %201 = vmatpush.msra.mxu0 %v175_v3  ;;  %v167_v10 = vld [vmem:[#allocation3] sm:$0xff]  ;;  %v251_v11 = vld [vmem:[#allocation14 + $0x18] sm:$0xff]  ;;  %v249_v13 = vld [vmem:[#allocation14 + $0x8] sm:$0xff]  ;;  %s986_s28 = sshll.u32 %s1341_s27, 4  ;;  %s987_s28 = int_to_ptr.vmem [resolvable:$true] %s986_s28 }
  0x28   :  { %239 = vmatpush.msra.mxu1 %v212_v4  ;;  %1039 = vmatpush.msra.mxu2 %v212_v4  ;;  %v248_v14 = vld [vmem:[#allocation14] sm:$0xff]  ;;  %v168_v15 = vld [vmem:[#allocation3 + $0x8] sm:$0xff]  ;;  %v1062_v18 = vld [vmem:[%s1643_s9] ss:$0 sm:$0xff] }
  0x29   :  { %202 = vmatpush.msra.mxu0 %v174_v5  ;;  %v171_v16 = vld [vmem:[#allocation8] sm:$0xff]  ;;  %v172_v17 = vld [vmem:[#allocation8 + $0x8] sm:$0xff]  ;;  %v1063_v19 = vld [vmem:[%s1642_s8] ss:$0 sm:$0xff] }
  0x2a   :  { %240 = vmatpush.msra.mxu1 %v211_v6  ;;  %1040 = vmatpush.msra.mxu2 %v211_v6  ;;  %v1064_v28 = vld [vmem:[%s1644_s10] ss:$0 sm:$0xff]  ;;  %s1339_s10 = smov 16  }
  0x2b   :  { %1007 = vmatmul.msk.f32.vlgmr.msra.gmra.mxu1 %vm181_vm0, %v169_v7  ;;  %203 = vmatpush.msra.mxu0 %v173_v8 }
  0x2c   :  { %1008 = vmatmul.msk.f32.vlgmr.msra.gmra.mxu2 %vm181_vm0, %v170_v9  ;;  %1005 = vmatmul.msk.f32.vlgmr.msra.gmra.mxu0 %vm181_vm0, %v167_v10 }
  0x2d   :  { %274 = vmatpush.msrb.mxu2 %v251_v11 }
  0x2f   :  { %275 = vmatpush.msrb.mxu2 %v250_v12 }
  0x31   :  { %276 = vmatpush.msrb.mxu2 %v249_v13 }
  0x33   :  { %277 = vmatpush.msrb.mxu2 %v248_v14 }
  0x34   :  { %1006 = vmatmul.msk.f32.gmra.mxu0 %vm181_vm0, %v168_v15  ;;  %1009 = vmatmul.msk.f32.vlgmr.msrb.gmra.mxu2 %vm181_vm0, %v171_v16 }
  0x3c   :  { %1010 = vmatmul.msk.f32.gmra.mxu2 %vm181_vm0, %v172_v17 }
  0xa8   :  { %v242_v20 = vpop.f32.mrf.mxu1 }
  0xa9   :  { %v243_v21 = vadd.f32 %v1062_v18, %v242_v20  ;;  %v205_v22 = vpop.f32.mrf.mxu0 }
  0xaa   :  { %v206_v23 = vadd.f32 %v1063_v19, %v205_v22 }
  0xab   :  { %605 = vrot.lane.b32.xlu1 %v243_v21, %s1336_s22  ;;  %436 = vrot.lane.b32.xlu0 %v243_v21, %s1337_s23 }
  0xac   :  { %1011 = vmatpush.xpose.msk.msra.mxu3 %vm285_vm1, %v243_v21  ;;  %603 = vrot.lane.b32.xlu2 %v206_v23, %s1336_s22 }
  0xaf   :  { %1012 = vmatmul.msk.f32.vlgmr.msra.gmra.mxu3 %vm285_vm1, %v206_v23  ;;  %v245_v24 = vpop.f32.mrf.mxu2 }
  0xb0   :  { %v246_v25 = vadd.f32 %v1062_v18, %v245_v24 }
  0xb1   :  { %v208_v26 = vpop.f32.mrf.mxu0 }
  0xb2   :  { %v209_v27 = vadd.f32 %v1063_v19, %v208_v26  ;;  %1013 = vmatpush.xpose.msk.msrb.mxu3 %vm285_vm1, %v246_v25 }
  0xb3   :  { %464 = vrot.lane.b32.xlu1 %v246_v25, %s1337_s23  ;;  %434 = vrot.lane.b32.xlu0 %v206_v23, %s1337_s23 }
  0xb4   :  { %462 = vrot.lane.b32.xlu2 %v209_v27, %s1337_s23 }
  0xb7   :  { %1014 = vmatmul.msk.f32.vlgmr.msrb.gmra.mxu3 %vm285_vm1, %v209_v27  ;;  %v279_v29 = vpop.f32.mrf.mxu2 }
  0xb8   :  { %v1476_v30 = vadd.f32 %v1064_v28, %v279_v29 }
  0xba   :  { %374 = vmatpush.msra.mxu3 %v1476_v30 }
  0xbb   :  { %772 = vrot.lane.b32.xlu1 %v243_v21, %s1338_s24  ;;  %633 = vrot.lane.b32.xlu0 %v246_v25, %s1336_s22 }
  0xbc   :  { %631 = vrot.lane.b32.xlu2 %v209_v27, %s1336_s22 }
  0xbf   :  { %v282_v31 = vpop.f32.mrf.mxu2 }
  0xc0   :  { %v1482_v32 = vadd.f32 %v1064_v28, %v282_v31 }
  0xc2   :  { %397 = vmatpush.msrb.mxu0 %v1482_v32  ;;  %v1057_v33 = vpack.i.bf16 %v1482_v32, %v1476_v30 }
  0xc3   :  { %800 = vrot.lane.b32.xlu1 %v246_v25, %s1338_s24  ;;  %770 = vrot.lane.b32.xlu0 %v206_v23, %s1338_s24 }
  0xc4   :  { %798 = vrot.lane.b32.xlu2 %v209_v27, %s1338_s24 }
  0xcb   :  { %1058 = vrot.lane.b32.xlu0 %v1057_v33, %s1337_s23 }
 0x106   :  { %v604_v34 = vpop.permute.xlu2 %603 }
 0x10e   :  { %v463_v37 = vpop.permute.xlu2 %462 }
 0x116   :  { %v632_v42 = vpop.permute.xlu2 %631 }
 0x11d   :  { %v606_v35 = vpop.permute.xlu1 %605  ;;  %v437_v36 = vpop.permute.xlu0 %436 }
 0x11e   :  { %1017 = vmatpush.xpose.msk.msrb.mxu1 %vm285_vm1, %v437_v36  ;;  %v799_v47 = vpop.permute.xlu2 %798 }
 0x122   :  { %1023 = vmatpush.xpose.msk.msra.mxu1 %vm285_vm1, %v606_v35 }
 0x125   :  { %v465_v38 = vpop.permute.xlu1 %464  ;;  %v435_v39 = vpop.permute.xlu0 %434 }
 0x126   :  { %1019 = vmatpush.xpose.msk.msra.mxu2 %vm285_vm1, %v465_v38  ;;  %1018 = vmatmul.msk.f32.vlgmr.msrb.gmra.mxu1 %vm285_vm1, %v435_v39 }
 0x129   :  { %1020 = vmatmul.msk.f32.vlgmr.msra.gmra.mxu2 %vm285_vm1, %v463_v37 }
 0x12d   :  { %v773_v40 = vpop.permute.xlu1 %772  ;;  %v634_v41 = vpop.permute.xlu0 %633 }
 0x12e   :  { %1024 = vmatmul.msk.f32.vlgmr.msra.gmra.mxu1 %vm285_vm1, %v604_v34  ;;  %1025 = vmatpush.xpose.msk.msrb.mxu2 %vm285_vm1, %v634_v41 }
 0x12f   :  { %1029 = vmatpush.xpose.msk.msrb.mxu1 %vm285_vm1, %v773_v40 }
 0x131   :  { %1026 = vmatmul.msk.f32.vlgmr.msrb.gmra.mxu2 %vm285_vm1, %v632_v42 }
 0x132   :  { %v309_v43 = vpop.f32.mrf.mxu3 }
 0x133   :  { %v338_v44 = vsel %vm285_vm1, %v309_v43, -inf }
 0x134   :  { %339 = vmax.xlane.f32.xlu0 %v338_v44 }
 0x135   :  { %v801_v45 = vpop.permute.xlu1 %800  ;;  %v771_v46 = vpop.permute.xlu0 %770 }
 0x136   :  { %1030 = vmatmul.msk.f32.vlgmr.msrb.gmra.mxu1 %vm285_vm1, %v771_v46  ;;  %1031 = vmatpush.xpose.msk.msra.mxu2 %vm285_vm1, %v801_v45 }
 0x139   :  { %1032 = vmatmul.msk.f32.vlgmr.msra.gmra.mxu2 %vm285_vm1, %v799_v47 }
 0x13a   :  { %v335_v48 = vpop.f32.mrf.mxu3 }
 0x13b   :  { %v341_v49 = vsel %vm285_vm1, %v335_v48, -inf }
 0x13c   :  { %342 = vmax.xlane.f32.xlu2 %v341_v49 }
 0x13d   :  { %v1059_v50 = vpop.permute.xlu0 %1058 }
 0x13e   :  { %v1061_v51 = vunpack.i.h.bf16 %v1059_v50  ;;  %v1060_v52 = vunpack.i.l.bf16 %v1059_v50 }
 0x140   :  { %530 = vmatpush.msrb.mxu3 %v1060_v52  ;;  %557 = vmatpush.msra.mxu0 %v1061_v51 }
 0x148   :  { %844 = vrot.lane.b32.xlu0 %v1476_v30, %s1338_s24 }
 0x150   :  { %703 = vrot.lane.b32.xlu0 %v1482_v32, %s1336_s22 }
 0x1a3   :  { %v459_v53 = vpop.f32.mrf.mxu1 }
 0x1a4   :  { %v490_v54 = vsel %vm285_vm1, %v459_v53, -inf }
 0x1a5   :  { %491 = vmax.xlane.f32.xlu1 %v490_v54 }
 0x1a7   :  { %v340_v55 = vpop.xlane.xlu0 %339 }
 0x1a8   :  { %v344_v56 = vsub.f32 %v309_v43, %v340_v55 }
 0x1aa   :  { %v346_v57 = vmul.f32 1.442695, %v344_v56 }
 0x1ab   :  { %v628_v58 = vpop.f32.mrf.mxu1 }
 0x1ac   :  { %1066 = vpow2.f32 %v346_v57  ;;  %v487_v59 = vpop.f32.mrf.mxu2  ;;  %v659_v60 = vsel %vm285_vm1, %v628_v58, -inf }
 0x1ad   :  { %660 = vmax.xlane.f32.xlu2 %v659_v60  ;;  %v493_v61 = vsel %vm285_vm1, %v487_v59, -inf }
 0x1ae   :  { %494 = vmax.xlane.f32.xlu1 %v493_v61 }
 0x1af   :  { %v343_v62 = vpop.xlane.xlu2 %342 }
 0x1b0   :  { %v345_v63 = vsub.f32 %v335_v48, %v343_v62 }
 0x1b2   :  { %v1511_v0 = vpop.eup %1066  ;;  %v348_v1 = vmul.f32 1.442695, %v345_v63 }
 0x1b3   :  { %1015 = vmatmul.msk.f32.vlgmr.msra.gmra.mxu3 %vm285_vm1, %v1511_v0  ;;  %v795_v2 = vpop.f32.mrf.mxu1  ;;  %v350_v42 = vsel %vm285_vm1, %v1511_v0, 0.0 }
 0x1b4   :  { %1068 = vpow2.f32 %v348_v1  ;;  %v826_v3 = vsel %vm285_vm1, %v795_v2, -inf  ;;  %v656_v4 = vpop.f32.mrf.mxu2 }
 0x1b5   :  { %827 = vmax.xlane.f32.xlu2 %v826_v3  ;;  %v662_v6 = vsel %vm285_vm1, %v656_v4, -inf }
 0x1ba   :  { %v1516_v5 = vpop.eup %1068  ;;  %v845_v7 = vpop.permute.xlu0 %844 }
 0x1bb   :  { %1016 = vmatmul.msk.f32.vlgmr.msrb.gmra.mxu0 %vm285_vm1, %v1516_v5  ;;  %v353_v44 = vsel %vm285_vm1, %v1516_v5, 0.0 }
 0x1bc   :  { %v823_v8 = vpop.f32.mrf.mxu2 }
 0x1bd   :  { %663 = vmax.xlane.f32.xlu2 %v662_v6  ;;  %v829_v9 = vsel %vm285_vm1, %v823_v8, -inf }
 0x1c2   :  { %v704_v10 = vpop.permute.xlu0 %703 }
 0x1c3   :  { %724 = vmatpush.msrb.mxu0 %v704_v10 }
 0x1c5   :  { %830 = vmax.xlane.f32.xlu2 %v829_v9 }
 0x1c7   :  { %677 = vrot.lane.b32.xlu1 %v1476_v30, %s1336_s22 }
 0x1dd   :  { %870 = vrot.lane.b32.xlu2 %v1482_v32, %s1338_s24 }
 0x218   :  { %v492_v11 = vpop.xlane.xlu1 %491 }
 0x219   :  { %v496_v12 = vsub.f32 %v459_v53, %v492_v11 }
 0x21b   :  { %v498_v13 = vmul.f32 1.442695, %v496_v12 }
 0x21d   :  { %1070 = vpow2.f32 %v498_v13 }
 0x220   :  { %v661_v14 = vpop.xlane.xlu2 %660 }
 0x221   :  { %v665_v15 = vsub.f32 %v628_v58, %v661_v14  ;;  %v495_v16 = vpop.xlane.xlu1 %494 }
 0x222   :  { %v497_v17 = vsub.f32 %v487_v59, %v495_v16 }
 0x223   :  { %v1071_v18 = vpop.eup %1070  ;;  %v667_v19 = vmul.f32 1.442695, %v665_v15 }
 0x224   :  { %v500_v20 = vmul.f32 1.442695, %v497_v17  ;;  %1021 = vmatmul.msk.f32.vlgmr.msrb.gmra.mxu3 %vm285_vm1, %v1071_v18  ;;  %v502_v21 = vsel %vm285_vm1, %v1071_v18, 0.0 }
 0x225   :  { %1072 = vpow2.f32 %v667_v19  ;;  %503 = vadd.xlane.f32.xlu1 %v502_v21 }
 0x226   :  { %1074 = vpow2.f32 %v500_v20 }
 0x228   :  { %v828_v22 = vpop.xlane.xlu2 %827 }
 0x229   :  { %v832_v23 = vsub.f32 %v795_v2, %v828_v22 }
 0x22b   :  { %v1073_v24 = vpop.eup %1072  ;;  %v834_v25 = vmul.f32 1.442695, %v832_v23 }
 0x22c   :  { %v1075_v26 = vpop.eup %1074  ;;  %v671_v27 = vsel %vm285_vm1, %v1073_v24, 0.0 }
 0x22d   :  { %1076 = vpow2.f32 %v834_v25  ;;  %1022 = vmatmul.msk.f32.vlgmr.msra.gmra.mxu0 %vm285_vm1, %v1075_v26  ;;  %672 = vadd.xlane.f32.xlu0 %v671_v27  ;;  %v505_v28 = vsel %vm285_vm1, %v1075_v26, 0.0 }
 0x22e   :  { %506 = vadd.xlane.f32.xlu1 %v505_v28 }
 0x230   :  { %v664_v29 = vpop.xlane.xlu2 %663 }
 0x231   :  { %v666_v30 = vsub.f32 %v656_v4, %v664_v29 }
 0x233   :  { %v1077_v31 = vpop.eup %1076  ;;  %v669_v32 = vmul.f32 1.442695, %v666_v30 }
 0x234   :  { %v838_v33 = vsel %vm285_vm1, %v1077_v31, 0.0 }
 0x235   :  { %1078 = vpow2.f32 %v669_v32  ;;  %839 = vadd.xlane.f32.xlu2 %v838_v33 }
 0x236   :  { %v1544_v49 = vpop.f32.mrf.mxu3 }
 0x238   :  { %v831_v34 = vpop.xlane.xlu2 %830  ;;  %v1551_v0 = vpop.f32.mrf.mxu0 }
 0x239   :  { %v833_v35 = vsub.f32 %v823_v8, %v831_v34  ;;  %v678_v36 = vpop.permute.xlu1 %677 }
 0x23a   :  { %698 = vmatpush.msra.mxu3 %v678_v36 }
 0x23b   :  { %v1079_v37 = vpop.eup %1078  ;;  %v836_v38 = vmul.f32 1.442695, %v833_v35  ;;  %1027 = vmatmul.msk.f32.vlgmr.msra.gmra.mxu3 %vm285_vm1, %v1073_v24 }
 0x23c   :  { %865 = vmatpush.msrb.mxu3 %v845_v7  ;;  %1028 = vmatmul.msk.f32.vlgmr.msrb.gmra.mxu0 %vm285_vm1, %v1079_v37  ;;  %v674_v39 = vsel %vm285_vm1, %v1079_v37, 0.0 }
 0x23d   :  { %1080 = vpow2.f32 %v836_v38  ;;  %675 = vadd.xlane.f32.xlu0 %v674_v39 }
 0x240   :  { %v871_v40 = vpop.permute.xlu2 %870 }
 0x241   :  { %891 = vmatpush.msra.mxu0 %v871_v40 }
 0x243   :  { %v1081_v41 = vpop.eup %1080  ;;  %1033 = vmatmul.msk.f32.vlgmr.msrb.gmra.mxu3 %vm285_vm1, %v1077_v31 }
 0x244   :  { %1034 = vmatmul.msk.f32.vlgmr.msra.gmra.mxu0 %vm285_vm1, %v1081_v41  ;;  %v841_v43 = vsel %vm285_vm1, %v1081_v41, 0.0 }
 0x245   :  { %351 = vadd.xlane.f32.xlu0 %v350_v42  ;;  %842 = vadd.xlane.f32.xlu1 %v841_v43 }
 0x24d   :  { %354 = vadd.xlane.f32.xlu1 %v353_v44 }
 0x298   :  { %v504_v45 = vpop.xlane.xlu1 %503 }
 0x299   :  { %1082 = vrcp.f32 %v504_v45  ;;  %v573_v52 = vand.u32 2147483648, %v504_v45  ;;  %v571_v54 = vand.u32 2147483647, %v504_v45  ;;  %vm567_vm3 = vweird.f32 %v504_v45 }
 0x29b   :  { %v574_v57 = vor.u32 1.1754944e-38, %v573_v52  ;;  %vm572_vm5 = vcmp.eq.f32.partialorder %v571_v54, 8.507059e+37 }
 0x29f   :  { %v1083_v46 = vpop.eup %1082 }
 0x2a0   :  { %v563_v47 = vmul.f32 %v1083_v46, %v504_v45  ;;  %v1542_v48 = vpop.xlane.xlu0 %672  ;;  %vm568_vm2 = vweird.f32 %v1083_v46 }
 0x2a1   :  { %1084 = vrcp.f32 %v1542_v48  ;;  %v507_v50 = vpop.xlane.xlu1 %506  ;;  %vm569_vm4 = vmor %vm567_vm3, %vm568_vm2  ;;  %v740_v24 = vand.u32 2147483648, %v1542_v48  ;;  %vm734_vm11 = vweird.f32 %v1542_v48  ;;  %v738_v25 = vand.u32 2147483647, %v1542_v48 }
 0x2a2   :  { %v564_v51 = vsub.f32 1.0, %v563_v47  ;;  %1086 = vrcp.f32 %v507_v50  ;;  %v587_v4 = vand.u32 2147483648, %v507_v50  ;;  %v585_v6 = vand.u32 2147483647, %v507_v50 }
 0x2a3   :  { %vm581_vm7 = vweird.f32 %v507_v50  ;;  %v741_v30 = vor.u32 1.1754944e-38, %v740_v24  ;;  %vm739_vm14 = vcmp.eq.f32.partialorder %v738_v25, 8.507059e+37  ;;  %v944_v24 = vld [vmem:[#allocation15 + $0x18] sm:$0xff] }
 0x2a4   :  { %v565_v53 = vmul.f32 %v1083_v46, %v564_v51  ;;  %v588_v10 = vor.u32 1.1754944e-38, %v587_v4  ;;  %vm586_vm9 = vcmp.eq.f32.partialorder %v585_v6, 8.507059e+37  ;;  %967 = vmatpush.msra.mxu1 %v944_v24 }
 0x2a6   :  { %v566_v55 = vadd.f32 %v1083_v46, %v565_v53 }
 0x2a7   :  { %v1547_v56 = vpop.eup %1084  ;;  %v532_v62 = vpop.f32.mrf.mxu3 }
 0x2a8   :  { %v1087_v58 = vpop.eup %1086  ;;  %v570_v59 = vsel %vm569_vm4, %v1083_v46, %v566_v55  ;;  %v1549_v60 = vpop.xlane.xlu2 %839  ;;  %v730_v2 = vmul.f32 %v1547_v56, %v1542_v48  ;;  %vm735_vm10 = vweird.f32 %v1547_v56 }
 0x2a9   :  { %v577_v61 = vmul.f32 %v1087_v58, %v507_v50  ;;  %v575_v63 = vsel %vm572_vm5, %v574_v57, %v570_v59  ;;  %1088 = vrcp.f32 %v1549_v60  ;;  %vm582_vm6 = vweird.f32 %v1087_v58  ;;  %vm736_vm12 = vmor %vm734_vm11, %vm735_vm10 }
 0x2aa   :  { %v590_v1 = vmul.f32 %v575_v63, %v532_v62  ;;  %v731_v7 = vsub.f32 1.0, %v730_v2  ;;  %vm583_vm8 = vmor %vm581_vm7, %vm582_vm6  ;;  %v559_v13 = vpop.f32.mrf.mxu0  ;;  %v907_v31 = vand.u32 2147483648, %v1549_v60  ;;  %vm901_vm4 = vweird.f32 %v1549_v60 }
 0x2ab   :  { %v578_v3 = vsub.f32 1.0, %v577_v61  ;;  %v905_v47 = vand.u32 2147483647, %v1549_v60 }
 0x2ac   :  { %594 = vrot.lane.b32.xlu0 %v590_v1, %s1328_s30  ;;  %v732_v17 = vmul.f32 %v1547_v56, %v731_v7  ;;  %v908_v52 = vor.u32 1.1754944e-38, %v907_v31 }
 0x2ad   :  { %v579_v5 = vmul.f32 %v1087_v58, %v578_v3 }
 0x2ae   :  { %v733_v20 = vadd.f32 %v1547_v56, %v732_v17 }
 0x2af   :  { %v580_v8 = vadd.f32 %v1087_v58, %v579_v5  ;;  %v1557_v9 = vpop.eup %1088 }
 0x2b0   :  { %v676_v11 = vpop.xlane.xlu0 %675  ;;  %v897_v15 = vmul.f32 %v1557_v9, %v1549_v60  ;;  %v737_v27 = vsel %vm736_vm12, %v1547_v56, %v733_v20  ;;  %vm902_vm2 = vweird.f32 %v1557_v9 }
 0x2b1   :  { %v584_v12 = vsel %vm583_vm8, %v1087_v58, %v580_v8  ;;  %1090 = vrcp.f32 %v676_v11  ;;  %v752_v33 = vand.u32 2147483647, %v676_v11  ;;  %v754_v34 = vand.u32 2147483648, %v676_v11  ;;  %vm1596_vm6 = vmor %vm901_vm4, %vm902_vm2 }
 0x2b2   :  { %v589_v14 = vsel %vm586_vm9, %v588_v10, %v584_v12  ;;  %v898_v19 = vsub.f32 1.0, %v897_v15  ;;  %v742_v36 = vsel %vm739_vm14, %v741_v30, %v737_v27  ;;  %vm748_vm15 = vweird.f32 %v676_v11  ;;  %v943_v27 = vld [vmem:[#allocation15 + $0x10] sm:$0xff] }
 0x2b3   :  { %v591_v16 = vmul.f32 %v589_v14, %v559_v13  ;;  %vm753_vm5 = vcmp.eq.f32.partialorder %v752_v33, 8.507059e+37  ;;  %v755_v50 = vor.u32 1.1754944e-38, %v754_v34  ;;  %vm906_vm9 = vcmp.eq.f32.partialorder %v905_v47, 8.507059e+37  ;;  %968 = vmatpush.msra.mxu1 %v943_v27 }
 0x2b4   :  { %v899_v28 = vmul.f32 %v1557_v9, %v898_v19 }
 0x2b5   :  { %596 = vrot.lane.b32.xlu0 %v591_v16, %s1328_s30 }
 0x2b6   :  { %v900_v39 = vadd.f32 %v1557_v9, %v899_v28  ;;  %v942_v28 = vld [vmem:[#allocation15 + $0x8] sm:$0xff] }
 0x2b7   :  { %v1091_v18 = vpop.eup %1090  ;;  %969 = vmatpush.msra.mxu1 %v942_v28 }
 0x2b8   :  { %v744_v21 = vmul.f32 %v1091_v18, %v676_v11  ;;  %v1565_v22 = vpop.xlane.xlu0 %351  ;;  %v1567_v23 = vpop.xlane.xlu1 %842  ;;  %vm749_vm13 = vweird.f32 %v1091_v18  ;;  %v904_v56 = vsel %vm1596_vm6, %v1557_v9, %v900_v39  ;;  %vm600_vm6 = vcmask 130112  }
 0x2b9   :  { %1092 = vrcp.f32 %v1565_v22  ;;  %v726_v42 = vpop.f32.mrf.mxu0  ;;  %vm1581_vm3 = vmor %vm748_vm15, %vm749_vm13  ;;  %v411_v53 = vand.u32 2147483647, %v1565_v22  ;;  %v413_v54 = vand.u32 2147483648, %v1565_v22  ;;  %v921_v59 = vand.u32 2147483648, %v1567_v23 }
 0x2ba   :  { %v745_v26 = vsub.f32 1.0, %v744_v21  ;;  %1094 = vrcp.f32 %v1567_v23  ;;  %v919_v61 = vand.u32 2147483647, %v1567_v23  ;;  %vm407_vm10 = vweird.f32 %v1565_v22 }
 0x2bb   :  { %vm915_vm11 = vweird.f32 %v1567_v23  ;;  %v909_v1 = vsel %vm906_vm9, %v908_v52, %v904_v56  ;;  %v414_v3 = vor.u32 1.1754944e-38, %v413_v54  ;;  %vm412_vm13 = vcmp.eq.f32.partialorder %v411_v53, 8.507059e+37 }
 0x2bc   :  { %v746_v29 = vmul.f32 %v1091_v18, %v745_v26  ;;  %v922_v9 = vor.u32 1.1754944e-38, %v921_v59  ;;  %vm920_vm15 = vcmp.eq.f32.partialorder %v919_v61, 8.507059e+37 }
 0x2be   :  { %v747_v32 = vadd.f32 %v1091_v18, %v746_v29  ;;  %v700_v35 = vpop.f32.mrf.mxu3  ;;  %v941_v29 = vld [vmem:[#allocation15] sm:$0xff] }
 0x2bf   :  { %v1093_v37 = vpop.eup %1092  ;;  %v757_v38 = vmul.f32 %v742_v36, %v700_v35  ;;  %970 = vmatpush.msra.mxu1 %v941_v29  ;;  %v1065_v35 = vld [vmem:[%s1645_s11] ss:$0 sm:$0xff] }
 0x2c0   :  { %v1095_v40 = vpop.eup %1094  ;;  %v403_v41 = vmul.f32 %v1093_v37, %v1565_v22  ;;  %v1585_v44 = vpop.xlane.xlu1 %354  ;;  %v751_v46 = vsel %vm1581_vm3, %v1091_v18, %v747_v32  ;;  %vm408_vm7 = vweird.f32 %v1093_v37  ;;  %v937_v36 = vld [vmem:[#allocation9] sm:$0xff] }
 0x2c1   :  { %v911_v45 = vmul.f32 %v1095_v40, %v1567_v23  ;;  %1096 = vrcp.f32 %v1585_v44  ;;  %761 = vrot.lane.b32.xlu2 %v757_v38, %s1339_s10  ;;  %v756_v58 = vsel %vm753_vm5, %v755_v50, %v751_v46  ;;  %vm916_vm8 = vweird.f32 %v1095_v40  ;;  %vm409_vm12 = vmor %vm407_vm10, %vm408_vm7  ;;  %v893_v13 = vpop.f32.mrf.mxu0 }
 0x2c2   :  { %v404_v48 = vsub.f32 1.0, %v403_v41  ;;  %v758_v4 = vmul.f32 %v756_v58, %v726_v42  ;;  %vm917_vm14 = vmor %vm915_vm11, %vm916_vm8  ;;  %v427_v16 = vand.u32 2147483648, %v1585_v44  ;;  %v425_v19 = vand.u32 2147483647, %v1585_v44 }
 0x2c3   :  { %v912_v55 = vsub.f32 1.0, %v911_v45  ;;  %vm421_vm3 = vweird.f32 %v1585_v44  ;;  %vm767_vm7 = vcmask 195712  }
 0x2c4   :  { %v405_v57 = vmul.f32 %v1093_v37, %v404_v48  ;;  %v428_v21 = vor.u32 1.1754944e-38, %v427_v16  ;;  %vm426_vm5 = vcmp.eq.f32.partialorder %v425_v19, 8.507059e+37 }
 0x2c5   :  { %v913_v60 = vmul.f32 %v1095_v40, %v912_v55 }
 0x2c6   :  { %v406_v62 = vadd.f32 %v1093_v37, %v405_v57  ;;  %v867_v63 = vpop.f32.mrf.mxu3 }
 0x2c7   :  { %v1097_v2 = vpop.eup %1096  ;;  %v914_v5 = vadd.f32 %v1095_v40, %v913_v60  ;;  %v924_v6 = vmul.f32 %v909_v1, %v867_v63 }
 0x2c8   :  { %v410_v7 = vsel %vm409_vm12, %v1093_v37, %v406_v62  ;;  %v417_v8 = vmul.f32 %v1097_v2, %v1585_v44  ;;  %vm422_vm2 = vweird.f32 %v1097_v2 }
 0x2c9   :  { %v415_v10 = vsel %vm412_vm13, %v414_v3, %v410_v7  ;;  %v918_v11 = vsel %vm917_vm14, %v1095_v40, %v914_v5  ;;  %763 = vrot.lane.b32.xlu2 %v758_v4, %s1339_s10  ;;  %928 = vrot.lane.b32.xlu1 %v924_v6, %s1340_s0  ;;  %vm423_vm4 = vmor %vm421_vm3, %vm422_vm2  ;;  %v938_v40 = vld [vmem:[#allocation9 + $0x8] sm:$0xff] }
 0x2ca   :  { %v418_v12 = vsub.f32 1.0, %v417_v8  ;;  %v923_v14 = vsel %vm920_vm15, %v922_v9, %v918_v11  ;;  %v430_v15 = vmul.f32 %v415_v10, %v1544_v49 }
 0x2cb   :  { %v925_v17 = vmul.f32 %v923_v14, %v893_v13 }
 0x2cc   :  { %v419_v18 = vmul.f32 %v1097_v2, %v418_v12  ;;  %432 = vst.msk [vmem:[#allocation2] sm:$0xff] %vm285_vm1, %v430_v15 }
 0x2cd   :  { %930 = vrot.lane.b32.xlu0 %v925_v17, %s1340_s0 }
 0x2ce   :  { %v420_v20 = vadd.f32 %v1097_v2, %v419_v18 }
 0x2d0   :  { %v424_v22 = vsel %vm423_vm4, %v1097_v2, %v420_v20 }
 0x2d1   :  { %v429_v23 = vsel %vm426_vm5, %v428_v21, %v424_v22 }
 0x2d2   :  { %v431_v49 = vmul.f32 %v429_v23, %v1551_v0 }
 0x2d4   :  { %433 = vst.msk [vmem:[#allocation2 + $0x8] sm:$0xff] %vm285_vm1, %v431_v49  ;;  %vm934_vm1 = vcmask 261312  }
 0x31b   :  { %v762_v25 = vpop.permute.xlu2 %761 }
 0x31e   :  { %v595_v26 = vpop.permute.xlu0 %594 }
 0x31f   :  { %601 = vst.msk [vmem:[#allocation2] sm:$0xff] %vm600_vm6, %v595_v26 }
 0x320   :  { %768 = vst.msk [vmem:[#allocation2] sm:$0xff] %vm767_vm7, %v762_v25 }
 0x323   :  { %v764_v31 = vpop.permute.xlu2 %763 }
 0x327   :  { %v597_v30 = vpop.permute.xlu0 %596 }
 0x328   :  { %602 = vst.msk [vmem:[#allocation2 + $0x8] sm:$0xff] %vm600_vm6, %v597_v30 }
 0x329   :  { %769 = vst.msk [vmem:[#allocation2 + $0x8] sm:$0xff] %vm767_vm7, %v764_v31 }
 0x33b   :  { %v929_v0 = vpop.permute.xlu1 %928 }
 0x33c   :  { %935 = vst.msk [vmem:[#allocation2] sm:$0xff] %vm934_vm1, %v929_v0 }
 0x33f   :  { %v931_v32 = vpop.permute.xlu0 %930 }
 0x340   :  { %936 = vst.msk [vmem:[#allocation2 + $0x8] sm:$0xff] %vm934_vm1, %v931_v32 }
 0x343   :  { %v939_v33 = vld [vmem:[#allocation2] sm:$0xff] }
 0x344   :  { %1035 = vmatmul.msk.f32.vlgmr.msra.gmra.mxu1 %vm181_vm0, %v939_v33 }
 0x347   :  { %v940_v34 = vld [vmem:[#allocation2 + $0x8] sm:$0xff] }
 0x34c   :  { %1036 = vmatmul.msk.f32.gmra.mxu1 %vm181_vm0, %v940_v34 }
 0x3c1   :  { %v972_v37 = vpop.f32.mrf.mxu1 }
 0x3c2   :  { %v973_v38 = vadd.f32 %v1065_v35, %v972_v37 }
 0x3c4   :  { %v978_v39 = vadd.f32 %v973_v38, %v937_v36 }
 0x3c6   :  { %980 = vst.msk [vmem:[#allocation17] sm:$0xff] %vm181_vm0, %v978_v39 }
 0x3c9   :  { %v975_v41 = vpop.f32.mrf.mxu1 }
 0x3ca   :  { %v976_v42 = vadd.f32 %v1065_v35, %v975_v41 }
 0x3cc   :  { %v979_v43 = vadd.f32 %v976_v42, %v938_v40 }
 0x3ce   :  { %981 = vst.msk [vmem:[#allocation17 + $0x8] sm:$0xff] %vm181_vm0, %v979_v43 }
 0x3cf   :  { %994 = dma.vmem_to_hbm [thread:$0]  %s987_s28, 256, %s989_s14, [#allocation5], %s1327_s29, %s1327_s29, %s1328_s30  }
 0x3d0   :  { %1324 = dma.done.wait [#allocation5], 256  }
 0x3d1   :  { %1325 = vsyncadd [#allocation5], 4294967040 }
 0x3d2   :  { %999 = vsyncpa [#allocation4], 1 }
 0x3d3   :  { %1000 = vsyncpa [#allocation7], 1 }
 0x3d4   :  { %1001 = vsyncpa [#allocation10], 1 }
 0x3d5   :  { %1002 = vsyncpa [#allocation13], 1 }
 0x3d6   :  { %1003 = vsyncpa [#allocation16], 1 }
 0x3d7   :  { %1004 = vsyncpa [#allocation5], 1 }

</bundles_post_ra>
